<compile_context>
chip_gen: v7x
topology: tpu7x:2x2x1
jax: 0.10.0
libtpu: 0.0.40
codegen_flags: <defaults>
</compile_context>

<pallas_src>
import math

import jax
import jax.numpy as jnp
import numpy as np
from jax.experimental import pallas as pl
from jax.experimental.pallas import tpu as pltpu


def _round_up(x, m):
    return ((x + m - 1) // m) * m


def _char_model_kernel(chars_ref, scale_ref, w_ref, out_ref):
    # chars_ref : (TR, T)   int32  char ids (padded positions == padding_idx)
    # scale_ref : (TR, 1)   f32    rowmask / max(len, 1)
    # w_ref     : (Vp, Dp)  f32    fused (emb[pad_row]=0) @ proj, zero-padded
    # out_ref   : (TR, Dp)  f32
    TR, T = chars_ref.shape
    Vp = w_ref.shape[0]

    chars = chars_ref[...]                                          # (TR, T)
    iota_v = jax.lax.broadcasted_iota(jnp.int32, (TR, Vp), 1)

    # Bag-of-chars counts.  No per-t validity mask: padded positions carry
    # padding_idx whose fused-weight row is zero, so they contribute nothing.
    counts = jnp.zeros((TR, Vp), dtype=jnp.float32)
    for t in range(T):  # T is small and static; unrolled
        counts = counts + (chars[:, t:t + 1] == iota_v).astype(jnp.float32)

    # nn.Dropout(p=0.5) is identity in eval mode.
    # TODO(synk): training-mode dropout would use pltpu.prng_seed/prng_random_bits.

    # Single fused MXU matmul: (counts @ emb) @ W == counts @ (emb @ W).
    out = jnp.dot(counts, w_ref[...], preferred_element_type=jnp.float32)

    # Per-row scale folds 1/length and the zero-length-row mask (zeros_tensor
    # concat + scatter in the reference) into one elementwise pass.
    out_ref[...] = out * scale_ref[...]


def char_model_forward(char_input, lengths, emb_table, proj_w, padding_idx=0):
    """Mirrors CharModel.forward. Returns (out (B,S,D) f32, lengths (B*S,) int32)."""
    B, S, T = char_input.shape
    N = B * S
    V, E = emb_table.shape
    D = proj_w.shape[1]

    # nn.Embedding(padding_idx): the padding row contributes zeros.
    emb = emb_table.at[padding_idx].set(0.0)
    # Fuse pooling and projection (both linear): fused_w = emb @ W, shape (V, D).
    fused_w = jnp.dot(emb, proj_w)

    # Lane-dense padding of the contraction/output dims to multiples of 128.
    Vp = _round_up(V, 128)
    Dp = _round_up(D, 128)
    fused_w = jnp.pad(fused_w, ((0, Vp - V), (0, Dp - D)))

    chars = char_input.reshape(N, T).astype(jnp.int32)
    lens = lengths.reshape(N).astype(jnp.int32)

    # Single per-row scale: 1/len for non-empty rows, 0 for empty rows.
    scale = jnp.where(lens > 0,
                      1.0 / jnp.maximum(lens, 1).astype(jnp.float32),
                      0.0).astype(jnp.float32)

    # Row tiling: fixed VMEM footprint, DMA/compute overlap, megacore sharding.
    tile_rows = min(512, _round_up(N, 8))
    N_pad = _round_up(N, tile_rows)
    chars = jnp.pad(chars, ((0, N_pad - N), (0, 0)),
                    constant_values=padding_idx)
    scale = jnp.pad(scale, (0, N_pad - N)).reshape(N_pad, 1)

    grid = (pl.cdiv(N_pad, tile_rows),)

    out_padded = pl.pallas_call(
        _char_model_kernel,
        out_shape=jax.ShapeDtypeStruct((N_pad, Dp), jnp.float32),
        grid_spec=pltpu.PrefetchScalarGridSpec(
            num_scalar_prefetch=0,
            grid=grid,
            in_specs=[
                pl.BlockSpec((tile_rows, T), lambda i: (i, 0)),   # row-streamed
                pl.BlockSpec((tile_rows, 1), lambda i: (i, 0)),   # row-streamed
                pl.BlockSpec((Vp, Dp), lambda i: (0, 0)),         # weights resident
            ],
            out_specs=pl.BlockSpec((tile_rows, Dp), lambda i: (i, 0)),
        ),
        compiler_params=pltpu.CompilerParams(
            dimension_semantics=("parallel",)),
    )(chars, scale, fused_w)

    out = out_padded[:N, :D].reshape(B, S, D)
    return out, lens


def _reference(char_input, lengths, emb_table, proj_w, padding_idx=0):
    """Pure-JAX reference of the stand-in forward (masked mean pool + linear)."""
    B, S, T = char_input.shape
    emb = emb_table.at[padding_idx].set(0.0)
    e = emb[char_input]                                               # (B,S,T,E)
    mask = (jnp.arange(T)[None, None, :] < lengths[..., None]).astype(jnp.float32)
    pooled = (e * mask[..., None]).sum(2) / jnp.maximum(
        lengths[..., None].astype(jnp.float32), 1.0)
    out = pooled @ proj_w
    return jnp.where(lengths[..., None] > 0, out, 0.0)


if __name__ == "__main__":
    key = jax.random.PRNGKey(0)
    # Small shapes consistent with the module.
    B, S, T = 2, 4, 8            # batch, seq_len, chars-per-token
    V, E, D = 32, 32, 32         # n_chars, emb_dim, output_dim
    padding_idx = 0

    k_emb, k_w, k_len, k_ids = jax.random.split(key, 4)

    # nn.Embedding init as in CharModel.init_embedding: U(-sqrt(3/emb_dim), +)
    init_range = math.sqrt(3.0 / E)
    emb_table = jax.random.uniform(k_emb, (V, E), jnp.float32,
                                   -init_range, init_range)
    # Deterministic stand-in projection weights for the abstract char_model.
    proj_w = jax.random.normal(k_w, (E, D), jnp.float32) * 0.1

    # lengths in [0, T]; zero-length rows exercise the padding path.
    lengths = jax.random.randint(k_len, (B, S), 0, T + 1)
    ids = jax.random.randint(k_ids, (B, S, T), 1, V)
    tpos = jnp.arange(T)[None, None, :]
    char_input = jnp.where(tpos < lengths[..., None], ids,
                           padding_idx).astype(jnp.int32)

    out, flat_lens = char_model_forward(char_input, lengths, emb_table, proj_w,
                                        padding_idx=padding_idx)
    jax.block_until_ready(out)

    assert out.shape == (B, S, D)
    ref = _reference(char_input, lengths, emb_table, proj_w, padding_idx)
    np.testing.assert_allclose(np.asarray(out), np.asarray(ref),
                               atol=1e-2, rtol=1e-2)
    print("KERNEL_OK")
</pallas_src>

<mosaic_0001>
module attributes {stable_mosaic.version = 11 : i64} {
  func.func @_char_model_kernel(%arg0: i32, %arg1: memref<8x8xi32, #tpu.memory_space<vmem>>, %arg2: memref<8x1xf32, #tpu.memory_space<vmem>>, %arg3: memref<128x128xf32, #tpu.memory_space<vmem>>, %arg4: memref<8x128xf32, #tpu.memory_space<vmem>>) attributes {dimension_semantics = [#tpu.dimension_semantics<parallel>], iteration_bounds = array<i64: 1>, scalar_prefetch = 0 : i64, scratch_operands = 0 : i64, tpu.core_type = #tpu.core_type<tc>, window_params = [{transform_indices = @transform_0, window_bounds = array<i64: 8, 8>}, {transform_indices = @transform_1, window_bounds = array<i64: 8, 1>}, {pipeline_mode = #tpu.pipeline_mode<synchronous>, transform_indices = @transform_2, window_bounds = array<i64: 128, 128>}, {transform_indices = @transform_3, window_bounds = array<i64: 8, 128>}]} {
    %c0 = arith.constant 0 : index
    %c0_0 = arith.constant 0 : index
    %0 = vector.load %arg1[%c0, %c0_0] : memref<8x8xi32, #tpu.memory_space<vmem>>, vector<8x8xi32>
    %1 = tpu.iota {dimensions = array<i32: 1>} : vector<8x128xi32>
    %cst = arith.constant 0.000000e+00 : f32
    %2 = vector.broadcast %cst : f32 to vector<8x128xf32>
    %3 = vector.extract_strided_slice %0 {offsets = [0, 0], sizes = [8, 1], strides = [1, 1]} : vector<8x8xi32> to vector<8x1xi32>
    %4 = vector.broadcast %3 : vector<8x1xi32> to vector<8x128xi32>
    %5 = arith.cmpi eq, %4, %1 : vector<8x128xi32>
    %6 = arith.extui %5 : vector<8x128xi1> to vector<8x128xi32>
    %7 = arith.sitofp %6 : vector<8x128xi32> to vector<8x128xf32>
    %8 = arith.addf %2, %7 : vector<8x128xf32>
    %9 = vector.extract_strided_slice %0 {offsets = [0, 1], sizes = [8, 1], strides = [1, 1]} : vector<8x8xi32> to vector<8x1xi32>
    %10 = vector.broadcast %9 : vector<8x1xi32> to vector<8x128xi32>
    %11 = arith.cmpi eq, %10, %1 : vector<8x128xi32>
    %12 = arith.extui %11 : vector<8x128xi1> to vector<8x128xi32>
    %13 = arith.sitofp %12 : vector<8x128xi32> to vector<8x128xf32>
    %14 = arith.addf %8, %13 : vector<8x128xf32>
    %15 = vector.extract_strided_slice %0 {offsets = [0, 2], sizes = [8, 1], strides = [1, 1]} : vector<8x8xi32> to vector<8x1xi32>
    %16 = vector.broadcast %15 : vector<8x1xi32> to vector<8x128xi32>
    %17 = arith.cmpi eq, %16, %1 : vector<8x128xi32>
    %18 = arith.extui %17 : vector<8x128xi1> to vector<8x128xi32>
    %19 = arith.sitofp %18 : vector<8x128xi32> to vector<8x128xf32>
    %20 = arith.addf %14, %19 : vector<8x128xf32>
    %21 = vector.extract_strided_slice %0 {offsets = [0, 3], sizes = [8, 1], strides = [1, 1]} : vector<8x8xi32> to vector<8x1xi32>
    %22 = vector.broadcast %21 : vector<8x1xi32> to vector<8x128xi32>
    %23 = arith.cmpi eq, %22, %1 : vector<8x128xi32>
    %24 = arith.extui %23 : vector<8x128xi1> to vector<8x128xi32>
    %25 = arith.sitofp %24 : vector<8x128xi32> to vector<8x128xf32>
    %26 = arith.addf %20, %25 : vector<8x128xf32>
    %27 = vector.extract_strided_slice %0 {offsets = [0, 4], sizes = [8, 1], strides = [1, 1]} : vector<8x8xi32> to vector<8x1xi32>
    %28 = vector.broadcast %27 : vector<8x1xi32> to vector<8x128xi32>
    %29 = arith.cmpi eq, %28, %1 : vector<8x128xi32>
    %30 = arith.extui %29 : vector<8x128xi1> to vector<8x128xi32>
    %31 = arith.sitofp %30 : vector<8x128xi32> to vector<8x128xf32>
    %32 = arith.addf %26, %31 : vector<8x128xf32>
    %33 = vector.extract_strided_slice %0 {offsets = [0, 5], sizes = [8, 1], strides = [1, 1]} : vector<8x8xi32> to vector<8x1xi32>
    %34 = vector.broadcast %33 : vector<8x1xi32> to vector<8x128xi32>
    %35 = arith.cmpi eq, %34, %1 : vector<8x128xi32>
    %36 = arith.extui %35 : vector<8x128xi1> to vector<8x128xi32>
    %37 = arith.sitofp %36 : vector<8x128xi32> to vector<8x128xf32>
    %38 = arith.addf %32, %37 : vector<8x128xf32>
    %39 = vector.extract_strided_slice %0 {offsets = [0, 6], sizes = [8, 1], strides = [1, 1]} : vector<8x8xi32> to vector<8x1xi32>
    %40 = vector.broadcast %39 : vector<8x1xi32> to vector<8x128xi32>
    %41 = arith.cmpi eq, %40, %1 : vector<8x128xi32>
    %42 = arith.extui %41 : vector<8x128xi1> to vector<8x128xi32>
    %43 = arith.sitofp %42 : vector<8x128xi32> to vector<8x128xf32>
    %44 = arith.addf %38, %43 : vector<8x128xf32>
    %45 = vector.extract_strided_slice %0 {offsets = [0, 7], sizes = [8, 1], strides = [1, 1]} : vector<8x8xi32> to vector<8x1xi32>
    %46 = vector.broadcast %45 : vector<8x1xi32> to vector<8x128xi32>
    %47 = arith.cmpi eq, %46, %1 : vector<8x128xi32>
    %48 = arith.extui %47 : vector<8x128xi1> to vector<8x128xi32>
    %49 = arith.sitofp %48 : vector<8x128xi32> to vector<8x128xf32>
    %50 = arith.addf %44, %49 : vector<8x128xf32>
    %c0_1 = arith.constant 0 : index
    %c0_2 = arith.constant 0 : index
    %51 = vector.load %arg3[%c0_1, %c0_2] : memref<128x128xf32, #tpu.memory_space<vmem>>, vector<128x128xf32>
    %cst_3 = arith.constant dense<0.000000e+00> : vector<8x128xf32>
    %52 = tpu.matmul %50, %51, %cst_3 {dimension_numbers = #tpu.dot_dimension_numbers<[1], [0], [0], [1], [0, 0, 1, 1], [], []>} : vector<8x128xf32>, vector<128x128xf32>, vector<8x128xf32> -> vector<8x128xf32>
    %c0_4 = arith.constant 0 : index
    %c0_5 = arith.constant 0 : index
    %53 = vector.load %arg2[%c0_4, %c0_5] : memref<8x1xf32, #tpu.memory_space<vmem>>, vector<8x1xf32>
    %54 = vector.broadcast %53 : vector<8x1xf32> to vector<8x128xf32>
    %55 = arith.mulf %52, %54 : vector<8x128xf32>
    %c0_6 = arith.constant 0 : index
    %c0_7 = arith.constant 0 : index
    %56 = vector.load %arg4[%c0_6, %c0_7] : memref<8x128xf32, #tpu.memory_space<vmem>>, vector<8x128xf32>
    tpu.vector_store %arg4[%c0_6, %c0_7], %55 {strides = array<i32>} : memref<8x128xf32, #tpu.memory_space<vmem>>, vector<8x128xf32>,
    return
  }
  func.func @transform_0(%arg0: i32) -> (i32, i32) {
    %c0_i32 = arith.constant 0 : i32
    %c0_i32_0 = arith.constant 0 : i32
    return %arg0, %c0_i32 : i32, i32
  }
  func.func @transform_1(%arg0: i32) -> (i32, i32) {
    %c0_i32 = arith.constant 0 : i32
    %c0_i32_0 = arith.constant 0 : i32
    return %arg0, %c0_i32 : i32, i32
  }
  func.func @transform_2(%arg0: i32) -> (i32, i32) {
    %c0_i32 = arith.constant 0 : i32
    %c0_i32_0 = arith.constant 0 : i32
    %c0_i32_1 = arith.constant 0 : i32
    return %c0_i32, %c0_i32_0 : i32, i32
  }
  func.func @transform_3(%arg0: i32) -> (i32, i32) {
    %c0_i32 = arith.constant 0 : i32
    %c0_i32_0 = arith.constant 0 : i32
    return %arg0, %c0_i32 : i32, i32
  }
}

</mosaic_0001>

<bundles_post_ra>
// kernel: tpu_custom_call.1
= control target key start
LH: loop header
LB: loop body
LE: loop exit
PB: predicated region body
PF: predicated region fallthrough
CT: control target
= control target key end

     0   :  { %8 = vsyncpa [#allocation3], 0  ;;  %s426_s0 = inlined_call_operand.vmem [shape: s32[8,8], index: 0, kind: input, shape index: {}]   ;;  %s427_s1 = inlined_call_operand.vmem [shape: f32[8,1], index: 1, kind: input, shape index: {}]   ;;  %s428_s2 = inlined_call_operand.hbm [shape: f32[128,128], index: 2, kind: input, shape index: {}]   ;;  %s429_s3 = inlined_call_operand.hbm [shape: f32[8,128], index: 3, kind: output, shape index: {}]  }
   0x1   :  { %9 = vsyncpa [#allocation4], 0  ;;  %s353_s12 = smov [#allocation2]   ;;  %s305_s16 = scalar_lea.hbm %s428_s2, 2048 }
   0x2   :  { %s19_s13 = sshll.u32 %s353_s12, 4  ;;  %p306_p0 = scmp.ne.s32.totalorder %s428_s2, %s305_s16  ;;  %s20_s13 = int_to_ptr.vmem [resolvable:$true] %s19_s13 }
   0x3   :  { %p309_p1 = scmp.lt.u32.totalorder %s305_s16, %s428_s2 }
   0x5   :  { %p311_p2 = pnand %p309_p1, %p306_p0 }
   0x7   :  { %314 = shalt.err (!%p311_p2)
}
   0x8   :  { %s315_s21 = scalar_lea.vmem %s20_s13, 2048  ;;  %p320_p4 = scmp.lt.s32.totalorder %s20_s13, %s20_s13 }
   0x9   :  { %p316_p3 = scmp.ne.s32.totalorder %s20_s13, %s315_s21  ;;  %p321_p5 = scmp.lt.s32.totalorder %s315_s21, %s315_s21 }
   0xb   :  { %p322_p6 = por %p321_p5, %p320_p4 }
   0xd   :  { %p323_p7 = pnand %p322_p6, %p316_p3 }
   0xf   :  { %326 = shalt.err (!%p323_p7)
}
  0x10   :  { %s354_s22 = smov 128   ;;  %s355_s23 = smov 8  }
  0x11   :  { %25 = dma.hbm_to_vmem [thread:$0]  %s428_s2, 2048, %s20_s13, [#allocation3], %s354_s22, %s354_s22, %s355_s23  }
  0x12   :  { %349 = dma.done.wait [#allocation3], 2048  }
  0x13   :  { %350 = vsyncadd [#allocation3], 4294965248  ;;  %v356_v0 = vmov 2   ;;  %v357_v1 = vmov 0   ;;  %v358_v2 = vmov 0.0|0.0   ;;  %v29_v3 = vld [vmem:[%s426_s0] sm:$0xff]  ;;  %v30_v36 = vlaneseq }
  0x14   :  { %298 = vset.pattern.permute.xlu1 %v356_v0  ;;  %296 = vset.pattern.permute.xlu0 %v357_v1  ;;  %v88_v4 = vld [vmem:[#allocation2] sm:$0xff]  ;;  %v89_v5 = vld [vmem:[#allocation2 + $0x8] sm:$0xff]  ;;  %v90_v7 = vld [vmem:[#allocation2 + $0x10] sm:$0xff]  ;;  %v359_v10 = vmov 3   ;;  %v360_v11 = vmov 1   ;;  %v361_v17 = vmov 4  }
  0x15   :  { %257 = vmatprep.subr.bf16.mxu0 %v358_v2  ;;  %47 = vperm.xlu1 %298, %v29_v3   ;;  %v258_v6 = vpack.c.bf16 %v89_v5, %v88_v4  ;;  %v91_v8 = vld [vmem:[#allocation2 + $0x18] sm:$0xff]  ;;  %v92_v12 = vld [vmem:[#allocation2 + $0x20] sm:$0xff]  ;;  %v93_v13 = vld [vmem:[#allocation2 + $0x28] sm:$0xff]  ;;  %v362_v18 = vmov 5   ;;  %v363_v22 = vmov 6   ;;  %v364_v26 = vmov 7  }
  0x16   :  { %33 = vperm.xlu0 %296, %v29_v3   ;;  %v261_v9 = vpack.c.bf16 %v91_v8, %v90_v7  ;;  %v264_v14 = vpack.c.bf16 %v93_v13, %v92_v12  ;;  %v94_v15 = vld [vmem:[#allocation2 + $0x30] sm:$0xff]  ;;  %v95_v16 = vld [vmem:[#allocation2 + $0x38] sm:$0xff]  ;;  %v96_v20 = vld [vmem:[#allocation2 + $0x40] sm:$0xff]  ;;  %vm365_vm0 = vmmov 0   ;;  %v366_v31 = vmov 0.0  }
  0x17   :  { %259 = vmatpush3.bf16.msra.mxu0 %v258_v6  ;;  %v267_v19 = vpack.c.bf16 %v95_v16, %v94_v15  ;;  %v97_v21 = vld [vmem:[#allocation2 + $0x48] sm:$0xff]  ;;  %v98_v24 = vld [vmem:[#allocation2 + $0x50] sm:$0xff]  ;;  %v99_v25 = vld [vmem:[#allocation2 + $0x58] sm:$0xff]  ;;  %254 = vmatprep.mubr.msk.f32.mxu0 %vm365_vm0, %v366_v31  ;;  %v31_v39 = vand.u32 127, %v30_v36 }
  0x18   :  { %260 = vmatprep.subr.bf16.mxu0 %v358_v2  ;;  %v270_v23 = vpack.c.bf16 %v97_v21, %v96_v20  ;;  %v273_v27 = vpack.c.bf16 %v99_v25, %v98_v24  ;;  %v100_v28 = vld [vmem:[#allocation2 + $0x60] sm:$0xff]  ;;  %v101_v29 = vld [vmem:[#allocation2 + $0x68] sm:$0xff]  ;;  %v102_v32 = vld [vmem:[#allocation2 + $0x70] sm:$0xff] }
  0x19   :  { %299 = vset.pattern.permute.xlu1 %v359_v10  ;;  %v276_v30 = vpack.c.bf16 %v101_v29, %v100_v28  ;;  %v103_v33 = vld [vmem:[#allocation2 + $0x78] sm:$0xff]  ;;  %v174_v34 = vld [vmem:[%s427_s1] sm:$0xff]  ;;  %s367_s1 = smov [#allocation5]  }
  0x1a   :  { %297 = vset.pattern.permute.xlu0 %v360_v11  ;;  %54 = vperm.xlu1 %299, %v29_v3   ;;  %v279_v35 = vpack.c.bf16 %v103_v33, %v102_v32  ;;  %s188_s28 = sshll.u32 %s367_s1, 4  ;;  %s189_s28 = int_to_ptr.vmem [resolvable:$true] %s188_s28 }
  0x1b   :  { %40 = vperm.xlu0 %297, %v29_v3   ;;  %262 = vmatpush3.bf16.msra.mxu0 %v261_v9  ;;  %s327_s29 = scalar_lea.vmem %s189_s28, 128  ;;  %p332_p9 = scmp.lt.s32.totalorder %s189_s28, %s189_s28 }
  0x1c   :  { %263 = vmatprep.subr.bf16.mxu0 %v358_v2  ;;  %p328_p8 = scmp.ne.s32.totalorder %s189_s28, %s327_s29  ;;  %p333_p10 = scmp.lt.s32.totalorder %s327_s29, %s327_s29 }
  0x1e   :  { %300 = vset.pattern.permute.xlu1 %v361_v17  ;;  %p334_p11 = por %p333_p10, %p332_p9 }
  0x1f   :  { %301 = vset.pattern.permute.xlu0 %v362_v18  ;;  %61 = vperm.xlu1 %300, %v29_v3  }
  0x20   :  { %68 = vperm.xlu0 %301, %v29_v3   ;;  %265 = vmatpush3.bf16.msra.mxu0 %v264_v14  ;;  %p335_p12 = pnand %p334_p11, %p328_p8 }
  0x21   :  { %266 = vmatprep.subr.bf16.mxu0 %v358_v2 }
  0x23   :  { %302 = vset.pattern.permute.xlu1 %v363_v22 }
  0x24   :  { %304 = vset.pattern.permute.xlu0 %v357_v1  ;;  %75 = vperm.xlu1 %302, %v29_v3  }
  0x25   :  { %268 = vmatpush3.bf16.msra.mxu0 %v267_v19  ;;  %177 = vperm.xlu0 %304, %v174_v34  }
  0x26   :  { %269 = vmatprep.subr.bf16.mxu0 %v358_v2 }
  0x28   :  { %303 = vset.pattern.permute.xlu1 %v364_v26 }
  0x29   :  { %271 = vmatpush3.bf16.msra.mxu0 %v270_v23  ;;  %82 = vperm.xlu1 %303, %v29_v3  }
  0x2a   :  { %272 = vmatprep.subr.bf16.mxu0 %v358_v2 }
  0x2d   :  { %274 = vmatpush3.bf16.msra.mxu0 %v273_v27 }
  0x2e   :  { %275 = vmatprep.subr.bf16.mxu0 %v358_v2 }
  0x31   :  { %277 = vmatpush3.bf16.msra.mxu0 %v276_v30 }
  0x32   :  { %278 = vmatprep.subr.bf16.mxu0 %v358_v2 }
  0x35   :  { %280 = vmatpush3.bf16.msra.mxu0 %v279_v35 }
  0x94   :  { %v48_v37 = vpop.permute.xlu1 %47 }
  0x95   :  { %v34_v38 = vpop.permute.xlu0 %33  ;;  %vm49_vm2 = vcmp.eq.s32.totalorder %v48_v37, %v31_v39 }
  0x96   :  { %vm35_vm1 = vcmp.eq.s32.totalorder %v34_v38, %v31_v39  ;;  %v199_v45 = vsel %vm49_vm2, 1.0, %v366_v31 }
  0x97   :  { %v197_v42 = vsel %vm35_vm1, 1.0, %v366_v31 }
  0x99   :  { %v55_v40 = vpop.permute.xlu1 %54 }
  0x9a   :  { %v41_v41 = vpop.permute.xlu0 %40  ;;  %vm56_vm4 = vcmp.eq.s32.totalorder %v55_v40, %v31_v39 }
  0x9b   :  { %vm42_vm3 = vcmp.eq.s32.totalorder %v41_v41, %v31_v39  ;;  %v200_v49 = vsel %vm56_vm4, 1.0, %v366_v31 }
  0x9c   :  { %v198_v43 = vsel %vm42_vm3, 1.0, %v366_v31 }
  0x9d   :  { %v45_v44 = vadd.f32 %v198_v43, %v197_v42 }
  0x9e   :  { %v62_v47 = vpop.permute.xlu1 %61 }
  0x9f   :  { %v52_v46 = vadd.f32 %v199_v45, %v45_v44  ;;  %v69_v48 = vpop.permute.xlu0 %68  ;;  %vm63_vm5 = vcmp.eq.s32.totalorder %v62_v47, %v31_v39 }
  0xa0   :  { %vm70_vm6 = vcmp.eq.s32.totalorder %v69_v48, %v31_v39  ;;  %v201_v51 = vsel %vm63_vm5, 1.0, %v366_v31 }
  0xa1   :  { %v59_v50 = vadd.f32 %v200_v49, %v52_v46  ;;  %v202_v53 = vsel %vm70_vm6, 1.0, %v366_v31 }
  0xa3   :  { %v66_v52 = vadd.f32 %v201_v51, %v59_v50  ;;  %v76_v54 = vpop.permute.xlu1 %75 }
  0xa4   :  { %vm77_vm7 = vcmp.eq.s32.totalorder %v76_v54, %v31_v39  ;;  %v178_v61 = vpop.permute.xlu0 %177 }
  0xa5   :  { %v73_v55 = vadd.f32 %v202_v53, %v66_v52  ;;  %v203_v56 = vsel %vm77_vm7, 1.0, %v366_v31 }
  0xa7   :  { %v80_v58 = vadd.f32 %v203_v56, %v73_v55 }
  0xa8   :  { %v83_v57 = vpop.permute.xlu1 %82 }
  0xa9   :  { %vm84_vm8 = vcmp.eq.s32.totalorder %v83_v57, %v31_v39 }
  0xaa   :  { %v204_v59 = vsel %vm84_vm8, 1.0, %v366_v31 }
  0xab   :  { %v87_v60 = vadd.f32 %v204_v59, %v80_v58 }
  0xad   :  { %255 = vmatmul.mubr.f32.vlgmr.msra.gmra.mrb[0].mxu0 %v87_v60 }
 0x180   :  { %v170_v62 = vpop.f32.mrb[0].mxu0 }
 0x181   :  { %v180_v63 = vmul.f32 %v178_v61, %v170_v62  ;;  %v256_v0 = vpop.f32.mrb[1].mxu0 }
 0x183   :  { %181 = vst [vmem:[#allocation5] sm:$0xff] %v180_v63 }
 0x184   :  { %338 = shalt.err (!%p335_p12)
}
 0x185   :  { %s339_s5 = scalar_lea.hbm %s429_s3, 128 }
 0x186   :  { %p340_p13 = scmp.ne.s32.totalorder %s429_s3, %s339_s5  ;;  %p343_p0 = scmp.lt.u32.totalorder %s339_s5, %s429_s3 }
 0x188   :  { %p345_p1 = pnand %p343_p0, %p340_p13 }
 0x18a   :  { %348 = shalt.err (!%p345_p1)
}
 0x18b   :  { %191 = dma.vmem_to_hbm [thread:$0]  %s189_s28, 128, %s429_s3, [#allocation4]  }
 0x18c   :  { %351 = dma.done.wait [#allocation4], 128  }
 0x18d   :  { %352 = vsyncadd [#allocation4], 4294967168 }
 0x18e   :  { %195 = vsyncpa [#allocation3], 1 }
 0x18f   :  { %196 = vsyncpa [#allocation4], 1 }

</bundles_post_ra>
